<compile_context>
chip_gen: v6e
topology: v6e:2x2x1
jax: 0.10.0
libtpu: 0.0.40
codegen_flags: <defaults>
</compile_context>

<pallas_src>
import jax
import jax.numpy as jnp
from jax.experimental import pallas as pl
from jax.experimental.pallas import tpu as pltpu


def net_x_plain_kernel(x_ref, w1_ref, b1_ref, w2_ref, b2_ref, o_ref):
    # Cast streamed f32 activations to bf16 in-kernel (free under the DMA).
    x = x_ref[...].astype(jnp.bfloat16)
    # Hidden layer: bf16 x bf16 on the MXU, f32 accumulation.
    h = jnp.dot(x, w1_ref[...], preferred_element_type=jnp.float32)
    # Bias add + sigmoid in f32 (VPU + EUP).
    h = jax.nn.sigmoid(h + b1_ref[...])
    # Output layer: cast activations to bf16 for the MXU, accumulate in f32.
    y = jnp.dot(h.astype(w2_ref.dtype), w2_ref[...],
                preferred_element_type=jnp.float32)
    o_ref[...] = (y + b2_ref[...]).astype(o_ref.dtype)


def _block_diag(w, n):
    """Block-diagonal of n copies of w: (a, b) -> (n*a, n*b)."""
    a, b = w.shape
    eye = jnp.eye(n, dtype=w.dtype)
    bd = (eye[:, :, None, None] * w[None, None, :, :]).transpose(0, 2, 1, 3)
    return bd.reshape(n * a, n * b)


def net_x_plain(x, w1, b1, w2, b2, *, batch_tile=32768):
    """Forward pass of Net_X_plain.

    x:  (B, x_dim) f32
    w1: (x_dim, width), b1: (1, width)   (transpose of nn.Linear.weight)
    w2: (width, x_dim), b2: (1, x_dim)
    Returns (B, x_dim) in x.dtype.  Note: activations/weights go through
    bf16 on the MXU (f32 accumulate), so results differ slightly from a pure
    f32 PyTorch forward.
    """
    B, x_dim = x.shape
    width = w1.shape[1]
    out_dtype = x.dtype

    # ---- lane-dense packing factor -----------------------------------
    pack = 128 // x_dim if (x_dim <= 128 and 128 % x_dim == 0) else 1
    L = pack * x_dim          # packed input/output lane width  (128 here)
    Lh = pack * width         # packed hidden lane width        (256 here)

    # ---- wrapper-side weight prep (tiny, one-time) --------------------
    w1b = w1.astype(jnp.bfloat16)
    w2b = w2.astype(jnp.bfloat16)
    w1_bd = _block_diag(w1b, pack) if pack > 1 else w1b          # (L, Lh)
    w2_bd = _block_diag(w2b, pack) if pack > 1 else w2b          # (Lh, L)
    b1_t = jnp.tile(b1.astype(jnp.float32), (1, pack))           # (1, Lh)
    b2_t = jnp.tile(b2.astype(jnp.float32), (1, pack))           # (1, L)

    # ---- pack X: (B, x_dim) -> (R, L), row-major reshape is free ------
    R = pl.cdiv(B, pack)
    B_pack = R * pack
    xp = x
    if B_pack != B:                       # at most pack-1 padded rows
        xp = jnp.pad(xp, ((0, B_pack - B), (0, 0)))
    xp = xp.reshape(R, L)

    # ---- tile selection ------------------------------------------------
    tr_max = max(8, (batch_tile // pack) // 8 * 8)   # packed rows per tile
    n_blocks = pl.cdiv(R, tr_max)
    if n_blocks == 1:
        TR = R
        # Split a single block in two (when cleanly possible) so v7x's two
        # TensorCores both get work under dimension_semantics=("parallel",).
        if R >= 16 and R % 16 == 0:
            n_blocks, TR = 2, R // 2
    else:
        TR = ((pl.cdiv(R, n_blocks) + 7) // 8) * 8   # minimal padding
    R_pad = n_blocks * TR
    if R_pad != R:
        xp = jnp.pad(xp, ((0, R_pad - R), (0, 0)))

    # ---- cost hint -----------------------------------------------------
    itemsize = jnp.dtype(out_dtype).itemsize
    cost = pl.CostEstimate(
        flops=2 * R_pad * L * Lh * 2,                 # two GEMMs
        transcendentals=R_pad * Lh,                   # sigmoid
        bytes_accessed=(R_pad * L * 4                 # X in (f32)
                        + R_pad * L * itemsize        # Y out
                        + w1_bd.size * 2 + w2_bd.size * 2
                        + b1_t.size * 4 + b2_t.size * 4),
    )

    vmem = pltpu.MemorySpace.VMEM
    out = pl.pallas_call(
        net_x_plain_kernel,
        out_shape=jax.ShapeDtypeStruct((R_pad, L), out_dtype),
        grid=(n_blocks,),
        in_specs=[
            # Streamed input tile: only X moves per grid step.
            pl.BlockSpec((TR, L), lambda i: (i, 0), memory_space=vmem),
            # Weights / biases: constant block index -> VMEM-resident.
            pl.BlockSpec((L, Lh), lambda i: (0, 0), memory_space=vmem),
            pl.BlockSpec((1, Lh), lambda i: (0, 0), memory_space=vmem),
            pl.BlockSpec((Lh, L), lambda i: (0, 0), memory_space=vmem),
            pl.BlockSpec((1, L), lambda i: (0, 0), memory_space=vmem),
        ],
        out_specs=pl.BlockSpec((TR, L), lambda i: (i, 0), memory_space=vmem),
        compiler_params=pltpu.CompilerParams(
            dimension_semantics=("parallel",),
        ),
        cost_estimate=cost,
    )(xp, w1_bd, b1_t, w2_bd, b2_t)

    # Unpack: (R_pad, L) -> (B, x_dim).  Slices are no-ops when no padding.
    if R_pad != R:
        out = out[:R]
    y = out.reshape(B_pack, x_dim)
    if B_pack != B:
        y = y[:B]
    return y


def reference_f32(x, w1, b1, w2, b2):
    h = jax.nn.sigmoid(x @ w1 + b1)
    return h @ w2 + b2


def reference_bf16(x, w1, b1, w2, b2):
    # Same bf16-input / f32-accumulate math as the kernel.
    h = jnp.dot(x.astype(jnp.bfloat16), w1.astype(jnp.bfloat16),
                preferred_element_type=jnp.float32) + b1
    h = jax.nn.sigmoid(h)
    y = jnp.dot(h.astype(jnp.bfloat16), w2.astype(jnp.bfloat16),
                preferred_element_type=jnp.float32) + b2
    return y


if __name__ == "__main__":
    # Shapes consistent with the module: x_dim=16, width=32.
    x_dim, width = 16, 32

    key = jax.random.PRNGKey(0)
    kw1, kb1, kw2, kb2, kx1, kx2, kx3, kx4 = jax.random.split(key, 8)

    # Deterministic init (mimics nn.Linear uniform(-1/sqrt(fan_in), 1/sqrt(fan_in)))
    lim1 = 1.0 / (x_dim ** 0.5)
    lim2 = 1.0 / (width ** 0.5)
    w1 = jax.random.uniform(kw1, (x_dim, width), jnp.float32, -lim1, lim1)
    b1 = jax.random.uniform(kb1, (1, width), jnp.float32, -lim1, lim1)
    w2 = jax.random.uniform(kw2, (width, x_dim), jnp.float32, -lim2, lim2)
    b2 = jax.random.uniform(kb2, (1, x_dim), jnp.float32, -lim2, lim2)

    def check(out, x, tag):
        assert out.shape == x.shape, tag
        assert jnp.allclose(out, reference_bf16(x, w1, b1, w2, b2),
                            atol=1e-2, rtol=1e-2), f"mismatch vs bf16 ref ({tag})"
        assert jnp.allclose(out, reference_f32(x, w1, b1, w2, b2),
                            atol=5e-2, rtol=5e-2), f"mismatch vs f32 ref ({tag})"

    # Case 1: tiny batch (single packed row, single grid step).
    x = jax.random.normal(kx1, (8, x_dim), dtype=jnp.float32)
    out = net_x_plain(x, w1, b1, w2, b2)
    jax.block_until_ready(out)
    check(out, x, "case1")

    # Case 2: multi-block grid with packed-row padding (B=200 -> R=25).
    x = jax.random.normal(kx2, (200, x_dim), dtype=jnp.float32)
    out = net_x_plain(x, w1, b1, w2, b2, batch_tile=128)
    jax.block_until_ready(out)
    check(out, x, "case2")

    # Case 3: ragged batch (B=203 not a multiple of pack=8).
    x = jax.random.normal(kx3, (203, x_dim), dtype=jnp.float32)
    out = net_x_plain(x, w1, b1, w2, b2, batch_tile=64)
    jax.block_until_ready(out)
    check(out, x, "case3")

    # Case 4: single-block size that auto-splits into 2 blocks (megacore path).
    x = jax.random.normal(kx4, (256, x_dim), dtype=jnp.float32)
    out = net_x_plain(x, w1, b1, w2, b2)
    jax.block_until_ready(out)
    check(out, x, "case4")

    print("KERNEL_OK")
</pallas_src>

<mosaic_0001>
module attributes {stable_mosaic.version = 11 : i64} {
  func.func @net_x_plain_kernel(%arg0: i32, %arg1: memref<1x128xf32, #tpu.memory_space<vmem>>, %arg2: memref<128x256xbf16, #tpu.memory_space<vmem>>, %arg3: memref<1x256xf32, #tpu.memory_space<vmem>>, %arg4: memref<256x128xbf16, #tpu.memory_space<vmem>>, %arg5: memref<1x128xf32, #tpu.memory_space<vmem>>, %arg6: memref<1x128xf32, #tpu.memory_space<vmem>>) attributes {dimension_semantics = [#tpu.dimension_semantics<parallel>], iteration_bounds = array<i64: 1>, scalar_prefetch = 0 : i64, scratch_operands = 0 : i64, tpu.core_type = #tpu.core_type<tc>, window_params = [{transform_indices = @transform_0, window_bounds = array<i64: 1, 128>}, {pipeline_mode = #tpu.pipeline_mode<synchronous>, transform_indices = @transform_1, window_bounds = array<i64: 128, 256>}, {pipeline_mode = #tpu.pipeline_mode<synchronous>, transform_indices = @transform_2, window_bounds = array<i64: 1, 256>}, {pipeline_mode = #tpu.pipeline_mode<synchronous>, transform_indices = @transform_3, window_bounds = array<i64: 256, 128>}, {pipeline_mode = #tpu.pipeline_mode<synchronous>, transform_indices = @transform_4, window_bounds = array<i64: 1, 128>}, {transform_indices = @transform_5, window_bounds = array<i64: 1, 128>}]} {
    %c0 = arith.constant 0 : index
    %c0_0 = arith.constant 0 : index
    %0 = vector.load %arg1[%c0, %c0_0] : memref<1x128xf32, #tpu.memory_space<vmem>>, vector<1x128xf32>
    %1 = arith.truncf %0 : vector<1x128xf32> to vector<1x128xbf16>
    %c0_1 = arith.constant 0 : index
    %c0_2 = arith.constant 0 : index
    %2 = vector.load %arg2[%c0_1, %c0_2] : memref<128x256xbf16, #tpu.memory_space<vmem>>, vector<128x256xbf16>
    %cst = arith.constant dense<0.000000e+00> : vector<1x256xf32>
    %3 = tpu.matmul %1, %2, %cst {dimension_numbers = #tpu.dot_dimension_numbers<[1], [0], [0], [1], [0, 0, 1, 1], [], []>} : vector<1x128xbf16>, vector<128x256xbf16>, vector<1x256xf32> -> vector<1x256xf32>
    %c0_3 = arith.constant 0 : index
    %c0_4 = arith.constant 0 : index
    %4 = vector.load %arg3[%c0_3, %c0_4] : memref<1x256xf32, #tpu.memory_space<vmem>>, vector<1x256xf32>
    %5 = arith.addf %3, %4 : vector<1x256xf32>
    %6 = arith.negf %5 : vector<1x256xf32>
    %7 = math.exp %6 : vector<1x256xf32>
    %cst_5 = arith.constant 1.000000e+00 : f32
    %8 = vector.broadcast %cst_5 : f32 to vector<1x256xf32>
    %9 = arith.addf %8, %7 : vector<1x256xf32>
    %10 = arith.divf %8, %9 : vector<1x256xf32>
    %11 = arith.truncf %10 : vector<1x256xf32> to vector<1x256xbf16>
    %c0_6 = arith.constant 0 : index
    %c0_7 = arith.constant 0 : index
    %12 = vector.load %arg4[%c0_6, %c0_7] : memref<256x128xbf16, #tpu.memory_space<vmem>>, vector<256x128xbf16>
    %cst_8 = arith.constant dense<0.000000e+00> : vector<1x128xf32>
    %13 = tpu.matmul %11, %12, %cst_8 {dimension_numbers = #tpu.dot_dimension_numbers<[1], [0], [0], [1], [0, 0, 1, 1], [], []>} : vector<1x256xbf16>, vector<256x128xbf16>, vector<1x128xf32> -> vector<1x128xf32>
    %c0_9 = arith.constant 0 : index
    %c0_10 = arith.constant 0 : index
    %14 = vector.load %arg5[%c0_9, %c0_10] : memref<1x128xf32, #tpu.memory_space<vmem>>, vector<1x128xf32>
    %15 = arith.addf %13, %14 : vector<1x128xf32>
    %c0_11 = arith.constant 0 : index
    %c0_12 = arith.constant 0 : index
    %16 = vector.load %arg6[%c0_11, %c0_12] : memref<1x128xf32, #tpu.memory_space<vmem>>, vector<1x128xf32>
    tpu.vector_store %arg6[%c0_11, %c0_12], %15 {strides = array<i32>} : memref<1x128xf32, #tpu.memory_space<vmem>>, vector<1x128xf32>,
    return
  }
  func.func @transform_0(%arg0: i32) -> (i32, i32) {
    %c0_i32 = arith.constant 0 : i32
    %c0_i32_0 = arith.constant 0 : i32
    return %arg0, %c0_i32 : i32, i32
  }
  func.func @transform_1(%arg0: i32) -> (i32, i32) {
    %c0_i32 = arith.constant 0 : i32
    %c0_i32_0 = arith.constant 0 : i32
    %c0_i32_1 = arith.constant 0 : i32
    return %c0_i32, %c0_i32_0 : i32, i32
  }
  func.func @transform_2(%arg0: i32) -> (i32, i32) {
    %c0_i32 = arith.constant 0 : i32
    %c0_i32_0 = arith.constant 0 : i32
    %c0_i32_1 = arith.constant 0 : i32
    return %c0_i32, %c0_i32_0 : i32, i32
  }
  func.func @transform_3(%arg0: i32) -> (i32, i32) {
    %c0_i32 = arith.constant 0 : i32
    %c0_i32_0 = arith.constant 0 : i32
    %c0_i32_1 = arith.constant 0 : i32
    return %c0_i32, %c0_i32_0 : i32, i32
  }
  func.func @transform_4(%arg0: i32) -> (i32, i32) {
    %c0_i32 = arith.constant 0 : i32
    %c0_i32_0 = arith.constant 0 : i32
    %c0_i32_1 = arith.constant 0 : i32
    return %c0_i32, %c0_i32_0 : i32, i32
  }
  func.func @transform_5(%arg0: i32) -> (i32, i32) {
    %c0_i32 = arith.constant 0 : i32
    %c0_i32_0 = arith.constant 0 : i32
    return %arg0, %c0_i32 : i32, i32
  }
}

</mosaic_0001>

<bundles_post_ra>
// kernel: tpu_custom_call.1
= control target key start
LH: loop header
LB: loop body
LE: loop exit
PB: predicated region body
PF: predicated region fallthrough
CT: control target
= control target key end

     0   :  { %10 = vsyncpa [#allocation3], 0  ;;  %s668_s0 = inlined_call_operand.hbm [shape: f32[1,128], index: 0, kind: input, shape index: {}]   ;;  %s669_s1 = inlined_call_operand.hbm [shape: bf16[128,256], index: 1, kind: input, shape index: {}]   ;;  %s670_s2 = inlined_call_operand.vmem [shape: f32[1,256], index: 2, kind: input, shape index: {}]   ;;  %s671_s3 = inlined_call_operand.hbm [shape: bf16[256,128], index: 3, kind: input, shape index: {}]   ;;  %s672_s4 = inlined_call_operand.vmem [shape: f32[1,128], index: 4, kind: input, shape index: {}]   ;;  %s673_s5 = inlined_call_operand.hbm [shape: f32[1,128], index: 5, kind: output, shape index: {}]  }
   0x1   :  { %11 = vsyncpa [#allocation6], 0 }
   0x2   :  { %12 = vsyncpa [#allocation4], 0  ;;  %s611_s18 = smov [#allocation5]  }
   0x3   :  { %s28_s19 = sshll.u32 %s611_s18, 4  ;;  %s29_s19 = int_to_ptr.vmem [resolvable:$true] %s28_s19 }
   0x4   :  { %s533_s20 = scalar_lea.vmem %s29_s19, 2048  ;;  %p538_p1 = scmp.lt.s32.totalorder %s29_s19, %s29_s19 }
   0x5   :  { %p534_p0 = scmp.ne.s32.totalorder %s29_s19, %s533_s20  ;;  %p539_p2 = scmp.lt.s32.totalorder %s533_s20, %s533_s20 }
   0x7   :  { %p540_p3 = por %p539_p2, %p538_p1 }
   0x9   :  { %p541_p4 = pnand %p540_p3, %p534_p0 }
   0xb   :  { %544 = shalt.err (!%p541_p4)
}
   0xc   :  { %s612_s21 = smov 128   ;;  %s613_s22 = smov 8  }
   0xd   :  { %34 = dma.hbm_to_vmem [thread:$0]  %s669_s1, 2048, %s29_s19, [#allocation6], %s612_s21, %s612_s21, %s613_s22  }
   0xe   :  { %s614_s25 = smov [#allocation2]   ;;  %s615_s27 = smov [#allocation7]  }
   0xf   :  { %s19_s26 = sshll.u32 %s614_s25, 4  ;;  %s42_s28 = sshll.u32 %s615_s27, 4  ;;  %s20_s26 = int_to_ptr.vmem [resolvable:$true] %s19_s26  ;;  %s43_s28 = int_to_ptr.vmem [resolvable:$true] %s42_s28 }
  0x10   :  { %s553_s29 = scalar_lea.vmem %s20_s26, 16  ;;  %s557_s30 = scalar_lea.vmem %s20_s26, 32 }
  0x11   :  { %p554_p5 = scmp.ne.s32.totalorder %s20_s26, %s553_s29  ;;  %p558_p6 = scmp.lt.s32.totalorder %s20_s26, %s20_s26 }
  0x12   :  { %p559_p7 = scmp.lt.s32.totalorder %s557_s30, %s553_s29 }
  0x14   :  { %p560_p8 = por %p559_p7, %p558_p6 }
  0x16   :  { %p561_p9 = pnand %p560_p8, %p554_p5 }
  0x18   :  { %564 = shalt.err (!%p561_p9)
}
  0x19   :  { %22 = dma.hbm_to_vmem [thread:$0]  %s668_s0, 16, %s20_s26, [#allocation3]  }
  0x1a   :  { %s573_s8 = scalar_lea.vmem %s43_s28, 2048  ;;  %p578_p11 = scmp.lt.s32.totalorder %s43_s28, %s43_s28 }
  0x1b   :  { %p574_p10 = scmp.ne.s32.totalorder %s43_s28, %s573_s8  ;;  %p579_p12 = scmp.lt.s32.totalorder %s573_s8, %s573_s8 }
  0x1d   :  { %p580_p13 = por %p579_p12, %p578_p11 }
  0x1f   :  { %p581_p0 = pnand %p580_p13, %p574_p10 }
  0x21   :  { %584 = shalt.err (!%p581_p0)
}
  0x22   :  { %s616_s1 = smov 64   ;;  %s617_s9 = smov 4  }
  0x23   :  { %48 = dma.hbm_to_vmem [thread:$0]  %s671_s3, 2048, %s43_s28, [#allocation6], %s616_s1, %s616_s1, %s617_s9  }
  0x24   :  { %605 = dma.done.wait [#allocation3], 16  }
  0x25   :  { %606 = vsyncadd [#allocation3], 4294967280 }
  0x26   :  { %607 = dma.done.wait [#allocation6], 4096  }
  0x27   :  { %608 = vsyncadd [#allocation6], 4294963200  ;;  %v618_v0 = vmov 0   ;;  %v477_v1 = vld [vmem:[#allocation5 + $0x74] ss:$8 sps:$4 sm:$0xff]   ;;  %v505_v23 = vld [vmem:[#allocation7 + $0x68] sm:$0xff]   ;;  %v161_v35 = vlaneseq }
  0x28   :  { %203 = vmatprep.mubr.bf16.mxu0 %v618_v0  ;;  %v479_v2 = vld [vmem:[#allocation5 + $0x70] ss:$8 sps:$4 sm:$0xff]   ;;  %171 = vmatprep.subr.bf16.mxu0 %v477_v1  ;;  %v480_v3 = vld [vmem:[#allocation5 + $0x64] ss:$8 sps:$4 sm:$0xff]   ;;  %v482_v4 = vld [vmem:[#allocation5 + $0x60] ss:$8 sps:$4 sm:$0xff]  }
  0x29   :  { %172 = vmatpush1.bf16.msra.mxu0 %v479_v2  ;;  %v483_v5 = vld [vmem:[#allocation5 + $0x54] ss:$8 sps:$4 sm:$0xff]   ;;  %v485_v6 = vld [vmem:[#allocation5 + $0x50] ss:$8 sps:$4 sm:$0xff]   ;;  %v486_v7 = vld [vmem:[#allocation5 + $0x44] ss:$8 sps:$4 sm:$0xff]  }
  0x2a   :  { %173 = vmatprep.subr.bf16.mxu0 %v480_v3  ;;  %v488_v8 = vld [vmem:[#allocation5 + $0x40] ss:$8 sps:$4 sm:$0xff]   ;;  %v489_v9 = vld [vmem:[#allocation5 + $0x34] ss:$8 sps:$4 sm:$0xff]   ;;  %v491_v10 = vld [vmem:[#allocation5 + $0x30] ss:$8 sps:$4 sm:$0xff]  }
  0x2b   :  { %v492_v11 = vld [vmem:[#allocation5 + $0x24] ss:$8 sps:$4 sm:$0xff]   ;;  %v494_v12 = vld [vmem:[#allocation5 + $0x20] ss:$8 sps:$4 sm:$0xff]   ;;  %v495_v13 = vld [vmem:[#allocation5 + $0x14] ss:$8 sps:$4 sm:$0xff]  }
  0x2c   :  { %v497_v14 = vld [vmem:[#allocation5 + $0x10] ss:$8 sps:$4 sm:$0xff]   ;;  %v498_v15 = vld [vmem:[#allocation5 + $0x4] ss:$8 sps:$4 sm:$0xff]   ;;  %v500_v16 = vld [vmem:[#allocation5] ss:$8 sps:$4 sm:$0xff]  }
  0x2d   :  { %174 = vmatpush1.bf16.msra.mxu0 %v482_v4  ;;  %v61_v17 = vld [vmem:[#allocation2] sm:$0x1]  ;;  %v503_v21 = vld [vmem:[#allocation7 + $0x70] sm:$0xff]   ;;  %v506_v24 = vld [vmem:[#allocation7 + $0x28] sm:$0xff]   ;;  %v162_v36 = vshrl.u32 %v161_v35, 7  ;;  %s619_s13 = smov [#allocation8]  }
  0x2e   :  { %175 = vmatprep.subr.bf16.mxu0 %v483_v5  ;;  %v62_v18 = vpack.c.bf16 %v61_v17, %v61_v17  ;;  %v501_v19 = vld [vmem:[#allocation7 + $0x78] sm:$0xff]   ;;  %v504_v22 = vld [vmem:[#allocation7 + $0x30] sm:$0xff]   ;;  %v507_v25 = vld [vmem:[#allocation7 + $0x60] sm:$0xff]   ;;  %s402_s14 = sshll.u32 %s619_s13, 4  ;;  %s403_s14 = int_to_ptr.vmem [resolvable:$true] %s402_s14 }
  0x2f   :  { %v502_v20 = vld [vmem:[#allocation7 + $0x38] sm:$0xff]   ;;  %446 = vmatprep.subr.bf16.mxu1 %v501_v19  ;;  %v508_v26 = vld [vmem:[#allocation7 + $0x20] sm:$0xff]   ;;  %v511_v29 = vld [vmem:[#allocation7 + $0x50] sm:$0xff]   ;;  %v163_v37 = vsub.s32 0, %v162_v36  ;;  %v167_v39 = vsub.s32 1, %v162_v36  ;;  %s585_s15 = scalar_lea.vmem %s403_s14, 16  ;;  %p590_p2 = scmp.lt.s32.totalorder %s403_s14, %s403_s14 }
  0x30   :  { %447 = vmatpush3.bf16.msra.mxu1 %v502_v20  ;;  %v509_v27 = vld [vmem:[#allocation7 + $0x58] sm:$0xff]   ;;  %v512_v30 = vld [vmem:[#allocation7 + $0x10] sm:$0xff]   ;;  %v513_v31 = vld [vmem:[#allocation7 + $0x48] sm:$0xff]   ;;  %p586_p1 = scmp.ne.s32.totalorder %s403_s14, %s585_s15  ;;  %s589_s16 = scalar_lea.vmem %s403_s14, 32 }
  0x31   :  { %176 = vmatpush1.bf16.msra.mxu0 %v485_v6  ;;  %448 = vmatprep.subr.bf16.mxu1 %v503_v21  ;;  %v510_v28 = vld [vmem:[#allocation7 + $0x18] sm:$0xff]   ;;  %v514_v32 = vld [vmem:[#allocation7 + $0x8] sm:$0xff]   ;;  %v515_v33 = vld [vmem:[#allocation7 + $0x40] sm:$0xff]   ;;  %p591_p3 = scmp.lt.s32.totalorder %s589_s16, %s585_s15 }
  0x32   :  { %177 = vmatprep.subr.bf16.mxu0 %v486_v7  ;;  %v516_v34 = vld [vmem:[#allocation7] sm:$0xff]   ;;  %v79_v38 = vld [vmem:[%s670_s2] sm:$0x3] }
  0x33   :  { %v164_v40 = vrot.slane %v79_v38, %v163_v37  ;;  %v168_v41 = vrot.slane %v79_v38, %v167_v39  ;;  %v258_v59 = vld [vmem:[%s672_s4] sm:$0x1]  ;;  %p592_p4 = por %p591_p3, %p590_p2 }
  0x34   :  { %449 = vmatpush3.bf16.msra.mxu1 %v504_v22 }
  0x35   :  { %178 = vmatpush1.bf16.msra.mxu0 %v488_v8  ;;  %450 = vmatprep.subr.bf16.mxu1 %v505_v23  ;;  %p593_p5 = pnand %p592_p4, %p586_p1 }
  0x36   :  { %179 = vmatprep.subr.bf16.mxu0 %v489_v9 }
  0x38   :  { %451 = vmatpush3.bf16.msra.mxu1 %v506_v24 }
  0x39   :  { %180 = vmatpush1.bf16.msra.mxu0 %v491_v10  ;;  %452 = vmatprep.subr.bf16.mxu1 %v507_v25 }
  0x3a   :  { %181 = vmatprep.subr.bf16.mxu0 %v492_v11 }
  0x3c   :  { %453 = vmatpush3.bf16.msra.mxu1 %v508_v26 }
  0x3d   :  { %182 = vmatpush1.bf16.msra.mxu0 %v494_v12  ;;  %454 = vmatprep.subr.bf16.mxu1 %v509_v27 }
  0x3e   :  { %183 = vmatprep.subr.bf16.mxu0 %v495_v13 }
  0x40   :  { %455 = vmatpush3.bf16.msra.mxu1 %v510_v28 }
  0x41   :  { %184 = vmatpush1.bf16.msra.mxu0 %v497_v14  ;;  %456 = vmatprep.subr.bf16.mxu1 %v511_v29 }
  0x42   :  { %185 = vmatprep.subr.bf16.mxu0 %v498_v15 }
  0x44   :  { %457 = vmatpush3.bf16.msra.mxu1 %v512_v30 }
  0x45   :  { %186 = vmatpush1.bf16.msra.mxu0 %v500_v16  ;;  %458 = vmatprep.subr.bf16.mxu1 %v513_v31 }
  0x48   :  { %204 = vmatmul.mubr.bf16.vlgmr.msra.gmra.mxu0 %v62_v18  ;;  %459 = vmatpush3.bf16.msra.mxu1 %v514_v32 }
  0x49   :  { %460 = vmatprep.subr.bf16.mxu1 %v515_v33 }
  0x4c   :  { %461 = vmatpush3.bf16.msra.mxu1 %v516_v34 }
 0x108   :  { %v205_v42 = vpop.f32.mrf.mxu0 }
 0x109   :  { %v206_v43 = vadd.f32 %v205_v42, %v164_v40 }
 0x10a   :  { %v207_v44 = vpop.f32.mrf.mxu0 }
 0x10b   :  { %v428_v45 = vmul.f32 -1.442695, %v206_v43  ;;  %v208_v46 = vadd.f32 %v207_v44, %v168_v41 }
 0x10c   :  { %v209_v47 = vpop.f32.mrf.mxu0 }
 0x10d   :  { %517 = vpow2.f32 %v428_v45  ;;  %v429_v48 = vmul.f32 -1.442695, %v208_v46 }
 0x10e   :  { %v210_v49 = vpop.f32.mrf.mxu0 }
 0x10f   :  { %519 = vpow2.f32 %v429_v48 }
 0x11a   :  { %v518_v50 = vpop.eup %517 }
 0x11b   :  { %v218_v51 = vadd.f32 1.0, %v518_v50 }
 0x11c   :  { %v520_v52 = vpop.eup %519 }
 0x11d   :  { %v219_v53 = vadd.f32 1.0, %v520_v52  ;;  %521 = vrcp.f32 %v218_v51 }
 0x11f   :  { %523 = vrcp.f32 %v219_v53 }
 0x12a   :  { %v522_v54 = vpop.eup %521 }
 0x12b   :  { %v224_v57 = vpack.c.bf16 %v522_v54, %v522_v54 }
 0x12c   :  { %v524_v55 = vpop.eup %523 }
 0x12d   :  { %v225_v56 = vpack.c.bf16 %v524_v55, %v524_v55 }
 0x12f   :  { %387 = vmatprep.mubr.bf16.mxu1 %v225_v56 }
 0x130   :  { %388 = vmatmul.mubr.bf16.vlgmr.msra.gmra.mxu1 %v224_v57 }
 0x1f0   :  { %v462_v58 = vpop.f32.mrf.mxu1 }
 0x1f2   :  { %v463_v60 = vpop.f32.mrf.mxu1 }
 0x1f3   :  { %v464_v61 = vadd.f32 %v463_v60, %v462_v58 }
 0x1f4   :  { %v465_v62 = vpop.f32.mrf.mxu1 }
 0x1f5   :  { %v390_v63 = vadd.f32 %v464_v61, %v258_v59 }
 0x1f6   :  { %v466_v0 = vpop.f32.mrf.mxu1 }
 0x1f7   :  { %395 = vst [vmem:[#allocation8] sm:$0x1] %v390_v63 }
 0x1f8   :  { %596 = shalt.err (!%p593_p5)
}
 0x1f9   :  { %405 = dma.vmem_to_hbm [thread:$0]  %s403_s14, 16, %s673_s5, [#allocation4]  }
 0x1fa   :  { %609 = dma.done.wait [#allocation4], 16  }
 0x1fb   :  { %610 = vsyncadd [#allocation4], 4294967280 }
 0x1fc   :  { %409 = vsyncpa [#allocation3], 1 }
 0x1fd   :  { %410 = vsyncpa [#allocation6], 1 }
 0x1fe   :  { %411 = vsyncpa [#allocation4], 1 }

</bundles_post_ra>
